<compile_context>
chip_gen: v7x
topology: tpu7x:2x2x1
jax: 0.10.0
libtpu: 0.0.40
codegen_flags: <defaults>
</compile_context>

<pallas_src>
import functools

import jax
import jax.numpy as jnp
from jax.experimental import pallas as pl
from jax.experimental.pallas import tpu as pltpu

LANE = 128      # vreg lane width    -> last-dim alignment
SUBLANE = 8     # vreg sublane width -> second-to-last-dim alignment


def _round_up(n, m):
    return ((n + m - 1) // m) * m


def _pad_axis(a, mult, axis):
    pad = (-a.shape[axis]) % mult
    if pad == 0:
        return a
    widths = [(0, 0)] * a.ndim
    widths[axis] = (0, pad)
    return jnp.pad(a, widths)


def _vmem_capacity_bytes():
    """Physical VMEM of the attached TPU; conservative fallback = 64 MiB (v7x)."""
    try:
        info = pltpu.get_tpu_info()
        cap = int(getattr(info, "vmem_capacity_bytes", 0))
        if cap > 0:
            return cap
    except Exception:
        pass
    return 64 * 1024 * 1024


# Generation-aware budgets.  v5e/v6e: 128 MiB physical VMEM; v7x: 64 MiB.
_VMEM_CAP = _vmem_capacity_bytes()
_FUSED_BUDGET = min(int(0.50 * _VMEM_CAP), 80 * 1024 * 1024)
_FUSED_VMEM_LIMIT = min(int(0.70 * _VMEM_CAP), 100 * 1024 * 1024)
_TILED_BUDGET = min(int(0.55 * _VMEM_CAP), 96 * 1024 * 1024)
_TILED_VMEM_LIMIT = min(int(0.70 * _VMEM_CAP), 112 * 1024 * 1024)
# Weight-tile targets: big-VMEM chips take a full-row (tk x 4096) bf16 weight
# block (x streamed once per M tile); v7x (64 MiB VMEM) gets a ~4 MiB block.
if _VMEM_CAP >= 100 * 1024 * 1024:           # v5e / v6e
    _TN_TARGET, _TK_TARGET = 4096, 1024      # ~8 MiB bf16 weight block
else:                                        # v7x
    _TN_TARGET, _TK_TARGET = 2048, 1024      # ~4 MiB bf16 weight block


def _pick_tile(dim_padded, target):
    """Largest multiple of LANE that divides dim_padded and is <= target."""
    t = max(LANE, (min(target, dim_padded) // LANE) * LANE)
    while dim_padded % t != 0:
        t -= LANE
    return t


# ---------------------------------------------------------------------------
# Path A: whole classifier fused into a single kernel (activations in VMEM).
# ---------------------------------------------------------------------------
def _fused_classifier_kernel(x_ref, *refs, num_layers, valid_out):
    """refs = (w0, b0, w1, b1, ..., w_{L-1}, b_{L-1}, o_ref); all padded."""
    w_refs = refs[0:2 * num_layers:2]
    b_refs = refs[1:2 * num_layers:2]
    o_ref = refs[2 * num_layers]

    h = x_ref[...]                              # bf16 (B_pad, F_pad)
    for i in range(num_layers):
        # bf16 x bf16 on the MXU, f32 accumulate.
        acc = jnp.dot(h, w_refs[i][...], preferred_element_type=jnp.float32)
        acc = acc + b_refs[i][...]              # (1, Fout_pad) broadcasts
        if i + 1 < num_layers:
            h = jnp.maximum(acc, 0.0).astype(jnp.bfloat16)   # ReLU (+Dropout=id)
        else:
            # log_softmax(dim=1) in f32; mask padded lanes first.
            col = jax.lax.broadcasted_iota(jnp.int32, acc.shape, 1)
            logits = jnp.where(col < valid_out, acc, jnp.float32(-1e30))
            m = jnp.max(logits, axis=-1, keepdims=True)
            z = logits - m
            lse = jnp.log(jnp.sum(jnp.exp(z), axis=-1, keepdims=True))
            h = z - lse
    o_ref[...] = h.astype(o_ref.dtype)


# ---------------------------------------------------------------------------
# Path B: per-layer (M, N, K)-tiled matmul with f32 accumulator (scales to
# real VGG16 classifier sizes where weights do not fit VMEM).
# ---------------------------------------------------------------------------
def _tiled_linear_kernel(x_ref, w_ref, b_ref, o_ref, acc_ref, *,
                         activation, valid_out):
    k = pl.program_id(2)
    nk = pl.num_programs(2)

    @pl.when(k == 0)
    def _init():
        acc_ref[...] = jnp.zeros_like(acc_ref)

    acc_ref[...] += jnp.dot(x_ref[...], w_ref[...],
                            preferred_element_type=jnp.float32)

    @pl.when(k == nk - 1)
    def _finalize():
        # Bias + activation only on the final k step (accumulator finalize).
        y = acc_ref[...] + b_ref[...]
        if activation == "relu":
            y = jnp.maximum(y, 0.0)
        elif activation == "log_softmax":
            # Caller guarantees the whole (padded) output row is one N tile.
            col = jax.lax.broadcasted_iota(jnp.int32, y.shape, 1)
            y = jnp.where(col < valid_out, y, jnp.float32(-1e30))
            m = jnp.max(y, axis=-1, keepdims=True)
            z = y - m
            lse = jnp.log(jnp.sum(jnp.exp(z), axis=-1, keepdims=True))
            y = z - lse
        o_ref[...] = y.astype(o_ref.dtype)


def pallas_tiled_linear(x, w, b, activation="none", valid_out=None,
                        out_dtype=jnp.bfloat16):
    """x: [B, Kp] bf16, w: [Kp, Np] bf16, b: [1, Np] f32 (Kp, Np 128-padded).

    Returns the FULL padded (Bp, Np) output (no slicing): callers chain padded
    activations layer-to-layer and slice [:B, :out] once at the very end.
    """
    B0, K = x.shape
    Kw, N = w.shape
    assert K == Kw, (K, Kw)
    assert K % LANE == 0 and N % LANE == 0
    if valid_out is None:
        valid_out = N

    # M tiling: cover the whole (padded) batch in one M tile whenever it is
    # small enough so W is streamed from HBM exactly once; for big batches
    # fall back to MXU-friendly 512-row tiles.
    if B0 <= 1024:
        tm = _round_up(B0, SUBLANE)
    else:
        tm = 512
    xp = _pad_axis(x, tm, 0)            # no-op on chained layers
    Bp = xp.shape[0]

    out_bytes = jnp.dtype(out_dtype).itemsize
    tk = _pick_tile(K, _TK_TARGET)
    if activation == "log_softmax":
        tn = N                          # softmax needs the whole row in one N tile
        shrink_tn = False
    else:
        tn = _pick_tile(N, _TN_TARGET)
        shrink_tn = True

    def vmem_need(tn_, tk_):
        return (2 * tm * tk_ * 2              # double-buffered bf16 x tile
                + 2 * tk_ * tn_ * 2           # double-buffered bf16 w tile
                + 2 * tn_ * 4                 # double-buffered f32 bias tile
                + 2 * tm * tn_ * out_bytes    # double-buffered output tile
                + tm * tn_ * 4)               # f32 accumulator scratch

    while shrink_tn and vmem_need(tn, tk) > _TILED_BUDGET and tn > LANE:
        tn = _pick_tile(N, max(LANE, tn // 2))
    while vmem_need(tn, tk) > _TILED_BUDGET and tk > LANE:
        tk = _pick_tile(K, max(LANE, tk // 2))

    grid = (Bp // tm, N // tn, K // tk)
    kernel = functools.partial(_tiled_linear_kernel,
                               activation=activation, valid_out=valid_out)
    # TODO(synk): sweep pipeline_mode=pl.Buffered(3) on the weight BlockSpec
    #             on v7x once tiles are large (low-risk ~5% class win).
    out = pl.pallas_call(
        kernel,
        out_shape=jax.ShapeDtypeStruct((Bp, N), out_dtype),
        grid_spec=pltpu.PrefetchScalarGridSpec(
            num_scalar_prefetch=0,
            grid=grid,
            in_specs=[
                pl.BlockSpec((tm, tk), lambda i, j, k: (i, k)),
                pl.BlockSpec((tk, tn), lambda i, j, k: (k, j)),
                pl.BlockSpec((1, tn), lambda i, j, k: (0, j)),
            ],
            out_specs=pl.BlockSpec((tm, tn), lambda i, j, k: (i, j)),
            scratch_shapes=[pltpu.VMEM((tm, tn), jnp.float32)],
        ),
        compiler_params=pltpu.CompilerParams(
            dimension_semantics=("parallel", "parallel", "arbitrary"),
            vmem_limit_bytes=_TILED_VMEM_LIMIT),
    )(xp, w, b)
    return out


# ---------------------------------------------------------------------------
# Classifier module (JAX/Pallas equivalent of CNN.__init__'s custom head).
# ---------------------------------------------------------------------------
class CNNClassifier:
    def __init__(self, input_size, output_size, hidden_layers, drop_p,
                 key=jax.random.PRNGKey(0)):
        self.input_size = input_size
        self.output_size = output_size
        self.drop_p = drop_p                       # identity in eval mode

        layer_sizes = [input_size] + list(hidden_layers) + [output_size]
        # Pre-pad every feature dim to a 128-lane multiple ONCE at init; the
        # tiled path only picks tile sizes that divide these padded dims, so
        # no weight is ever re-padded (copied) at forward time.
        self.padded_sizes = [_round_up(s, LANE) for s in layer_sizes]

        self.params = []                           # [(w bf16 padded, b f32 padded)]
        for idx, (fan_in, fan_out) in enumerate(zip(layer_sizes[:-1],
                                                    layer_sizes[1:])):
            key, wk, bk = jax.random.split(key, 3)
            bound = float(fan_in) ** -0.5          # nn.Linear default init
            w = jax.random.uniform(wk, (fan_in, fan_out), jnp.float32,
                                   -bound, bound)
            b = jax.random.uniform(bk, (fan_out,), jnp.float32, -bound, bound)
            fin_p = self.padded_sizes[idx]
            fout_p = self.padded_sizes[idx + 1]
            w_pad = jnp.zeros((fin_p, fout_p), jnp.float32)
            w_pad = w_pad.at[:fan_in, :fan_out].set(w)
            b_pad = jnp.zeros((1, fout_p), jnp.float32)
            b_pad = b_pad.at[0, :fan_out].set(b)
            self.params.append((w_pad.astype(jnp.bfloat16), b_pad))

    # Generation-aware VMEM budget for the fully-fused path.
    def _fused_fits_vmem(self, b_pad):
        need = b_pad * self.padded_sizes[0] * 2            # x (bf16)
        for w, b in self.params:
            need += w.size * 2 + b.size * 4                # bf16 W, f32 b
        need += 3 * b_pad * max(self.padded_sizes) * 4     # activation temps
        return need <= _FUSED_BUDGET

    def _forward_fused(self, xp):
        num_layers = len(self.params)
        flat = []
        for w, b in self.params:
            flat += [w, b]
        b_pad = xp.shape[0]
        out_pad = self.params[-1][0].shape[1]
        kernel = functools.partial(_fused_classifier_kernel,
                                   num_layers=num_layers,
                                   valid_out=self.output_size)
        vmem = pl.BlockSpec(memory_space=pltpu.MemorySpace.VMEM)
        # TODO(synk): gridless call runs on one TensorCore on v7x megacore;
        #             VGG-sized layers take Path B which uses both cores via
        #             dimension_semantics=("parallel", ...).
        return pl.pallas_call(
            kernel,
            out_shape=jax.ShapeDtypeStruct((b_pad, out_pad), jnp.float32),
            in_specs=[vmem] * (1 + 2 * num_layers),
            out_specs=vmem,
            compiler_params=pltpu.CompilerParams(
                vmem_limit_bytes=_FUSED_VMEM_LIMIT),
        )(xp, *flat)

    def _forward_tiled(self, xp):
        # Chain PADDED activations (bf16 written straight from the kernel);
        # Np of layer i == padded K of layer i+1, so no re-pad / slice / cast
        # between layers.  Slice once in __call__.
        h = xp
        n_layers = len(self.params)
        for i, (w, b) in enumerate(self.params):
            last = (i == n_layers - 1)
            h = pallas_tiled_linear(
                h, w, b,
                activation="log_softmax" if last else "relu",
                valid_out=self.output_size if last else None,
                out_dtype=jnp.float32 if last else jnp.bfloat16)
        return h

    def __call__(self, x, force_tiled=False):
        B, F = x.shape
        assert F == self.input_size
        xp = _pad_axis(_pad_axis(x, LANE, 1), SUBLANE, 0).astype(jnp.bfloat16)
        if force_tiled or not self._fused_fits_vmem(xp.shape[0]):
            out = self._forward_tiled(xp)
        else:
            out = self._forward_fused(xp)
        return out[:B, :self.output_size]


if __name__ == "__main__":
    # Small, deterministic example consistent with the module's classifier.
    batch = 8
    input_size = 64
    hidden_layers = [32, 32]
    drop_p = [0.5, 0.0]
    output_size = 16

    key = jax.random.PRNGKey(0)
    key, xk = jax.random.split(key)
    x = jax.random.normal(xk, (batch, input_size), jnp.float32)

    model = CNNClassifier(input_size, output_size, hidden_layers, drop_p,
                          key=key)

    out_fused = jax.block_until_ready(model(x))                    # Path A
    out_tiled = jax.block_until_ready(model(x, force_tiled=True))  # Path B

    assert out_fused.shape == (batch, output_size)
    assert out_tiled.shape == (batch, output_size)

    # log_softmax rows must exponentiate-sum to 1 (f32 reductions in-kernel).
    row_sums_f = jnp.sum(jnp.exp(out_fused), axis=1)
    row_sums_t = jnp.sum(jnp.exp(out_tiled), axis=1)
    assert jnp.allclose(row_sums_f, 1.0, atol=1e-3), row_sums_f
    assert jnp.allclose(row_sums_t, 1.0, atol=1e-3), row_sums_t
    # Both paths compute the same math on the same bf16 weights.
    assert jnp.allclose(out_fused, out_tiled, atol=1e-2, rtol=1e-2)

    print("KERNEL_OK")
</pallas_src>

<mosaic_0001>
module attributes {stable_mosaic.version = 11 : i64} {
  func.func @_fused_classifier_kernel(%arg0: memref<8x128xbf16, #tpu.memory_space<vmem>>, %arg1: memref<128x128xbf16, #tpu.memory_space<vmem>>, %arg2: memref<1x128xf32, #tpu.memory_space<vmem>>, %arg3: memref<128x128xbf16, #tpu.memory_space<vmem>>, %arg4: memref<1x128xf32, #tpu.memory_space<vmem>>, %arg5: memref<128x128xbf16, #tpu.memory_space<vmem>>, %arg6: memref<1x128xf32, #tpu.memory_space<vmem>>, %arg7: memref<8x128xf32, #tpu.memory_space<vmem>>) attributes {dimension_semantics = [], scalar_prefetch = 0 : i64, scratch_operands = 0 : i64, tpu.core_type = #tpu.core_type<tc>} {
    %c0 = arith.constant 0 : index
    %c0_0 = arith.constant 0 : index
    %0 = vector.load %arg0[%c0, %c0_0] : memref<8x128xbf16, #tpu.memory_space<vmem>>, vector<8x128xbf16>
    %c0_1 = arith.constant 0 : index
    %c0_2 = arith.constant 0 : index
    %1 = vector.load %arg1[%c0_1, %c0_2] : memref<128x128xbf16, #tpu.memory_space<vmem>>, vector<128x128xbf16>
    %cst = arith.constant dense<0.000000e+00> : vector<8x128xf32>
    %2 = tpu.matmul %0, %1, %cst {dimension_numbers = #tpu.dot_dimension_numbers<[1], [0], [0], [1], [0, 0, 1, 1], [], []>} : vector<8x128xbf16>, vector<128x128xbf16>, vector<8x128xf32> -> vector<8x128xf32>
    %c0_3 = arith.constant 0 : index
    %c0_4 = arith.constant 0 : index
    %3 = vector.load %arg2[%c0_3, %c0_4] : memref<1x128xf32, #tpu.memory_space<vmem>>, vector<1x128xf32>
    %4 = vector.broadcast %3 : vector<1x128xf32> to vector<8x128xf32>
    %5 = arith.addf %2, %4 : vector<8x128xf32>
    %cst_5 = arith.constant 0.000000e+00 : f32
    %6 = vector.broadcast %cst_5 : f32 to vector<8x128xf32>
    %7 = arith.maximumf %5, %6 : vector<8x128xf32>
    %8 = arith.truncf %7 : vector<8x128xf32> to vector<8x128xbf16>
    %c0_6 = arith.constant 0 : index
    %c0_7 = arith.constant 0 : index
    %9 = vector.load %arg3[%c0_6, %c0_7] : memref<128x128xbf16, #tpu.memory_space<vmem>>, vector<128x128xbf16>
    %cst_8 = arith.constant dense<0.000000e+00> : vector<8x128xf32>
    %10 = tpu.matmul %8, %9, %cst_8 {dimension_numbers = #tpu.dot_dimension_numbers<[1], [0], [0], [1], [0, 0, 1, 1], [], []>} : vector<8x128xbf16>, vector<128x128xbf16>, vector<8x128xf32> -> vector<8x128xf32>
    %c0_9 = arith.constant 0 : index
    %c0_10 = arith.constant 0 : index
    %11 = vector.load %arg4[%c0_9, %c0_10] : memref<1x128xf32, #tpu.memory_space<vmem>>, vector<1x128xf32>
    %12 = vector.broadcast %11 : vector<1x128xf32> to vector<8x128xf32>
    %13 = arith.addf %10, %12 : vector<8x128xf32>
    %cst_11 = arith.constant 0.000000e+00 : f32
    %14 = vector.broadcast %cst_11 : f32 to vector<8x128xf32>
    %15 = arith.maximumf %13, %14 : vector<8x128xf32>
    %16 = arith.truncf %15 : vector<8x128xf32> to vector<8x128xbf16>
    %c0_12 = arith.constant 0 : index
    %c0_13 = arith.constant 0 : index
    %17 = vector.load %arg5[%c0_12, %c0_13] : memref<128x128xbf16, #tpu.memory_space<vmem>>, vector<128x128xbf16>
    %cst_14 = arith.constant dense<0.000000e+00> : vector<8x128xf32>
    %18 = tpu.matmul %16, %17, %cst_14 {dimension_numbers = #tpu.dot_dimension_numbers<[1], [0], [0], [1], [0, 0, 1, 1], [], []>} : vector<8x128xbf16>, vector<128x128xbf16>, vector<8x128xf32> -> vector<8x128xf32>
    %c0_15 = arith.constant 0 : index
    %c0_16 = arith.constant 0 : index
    %19 = vector.load %arg6[%c0_15, %c0_16] : memref<1x128xf32, #tpu.memory_space<vmem>>, vector<1x128xf32>
    %20 = vector.broadcast %19 : vector<1x128xf32> to vector<8x128xf32>
    %21 = arith.addf %18, %20 : vector<8x128xf32>
    %22 = tpu.iota {dimensions = array<i32: 1>} : vector<8x128xi32>
    %c16_i32 = arith.constant 16 : i32
    %23 = vector.broadcast %c16_i32 : i32 to vector<8x128xi32>
    %24 = arith.cmpi slt, %22, %23 : vector<8x128xi32>
    %cst_17 = arith.constant -1.000000e+30 : f32
    %25 = vector.broadcast %cst_17 : f32 to vector<8x128xf32>
    %26 = arith.select %24, %21, %25 : vector<8x128xi1>, vector<8x128xf32>
    %cst_18 = arith.constant dense<0xFF800000> : vector<8xf32>
    %27 = vector.multi_reduction <maximumf>, %26, %cst_18 [1] : vector<8x128xf32> to vector<8xf32>
    %28 = vector.shape_cast %27 : vector<8xf32> to vector<8x1xf32>
    %29 = vector.broadcast %28 : vector<8x1xf32> to vector<8x128xf32>
    %30 = arith.subf %26, %29 : vector<8x128xf32>
    %31 = math.exp %30 : vector<8x128xf32>
    %cst_19 = arith.constant dense<0.000000e+00> : vector<8xf32>
    %32 = vector.multi_reduction <add>, %31, %cst_19 [1] : vector<8x128xf32> to vector<8xf32>
    %33 = vector.shape_cast %32 : vector<8xf32> to vector<8x1xf32>
    %34 = math.log %33 : vector<8x1xf32>
    %35 = vector.broadcast %34 : vector<8x1xf32> to vector<8x128xf32>
    %36 = arith.subf %30, %35 : vector<8x128xf32>
    %c0_20 = arith.constant 0 : index
    %c0_21 = arith.constant 0 : index
    %37 = vector.load %arg7[%c0_20, %c0_21] : memref<8x128xf32, #tpu.memory_space<vmem>>, vector<8x128xf32>
    tpu.vector_store %arg7[%c0_20, %c0_21], %36 {strides = array<i32>} : memref<8x128xf32, #tpu.memory_space<vmem>>, vector<8x128xf32>,
    return
  }
}

</mosaic_0001>

<bundles_post_ra>
// kernel: tpu_custom_call.1
= control target key start
LH: loop header
LB: loop body
LE: loop exit
PB: predicated region body
PF: predicated region fallthrough
CT: control target
= control target key end

     0   :  { %12 = vsyncpa [#allocation3], 0  ;;  %s877_s0 = inlined_call_operand.hbm [shape: bf16[8,128], index: 0, kind: input, shape index: {}]   ;;  %s878_s1 = inlined_call_operand.hbm [shape: bf16[128,128], index: 1, kind: input, shape index: {}]   ;;  %s879_s2 = inlined_call_operand.vmem [shape: f32[1,128], index: 2, kind: input, shape index: {}]   ;;  %s880_s3 = inlined_call_operand.hbm [shape: bf16[128,128], index: 3, kind: input, shape index: {}]   ;;  %s881_s4 = inlined_call_operand.vmem [shape: f32[1,128], index: 4, kind: input, shape index: {}]   ;;  %s882_s5 = inlined_call_operand.hbm [shape: bf16[128,128], index: 5, kind: input, shape index: {}]   ;;  %s883_s6 = inlined_call_operand.vmem [shape: f32[1,128], index: 6, kind: input, shape index: {}]   ;;  %s884_s7 = inlined_call_operand.hbm [shape: f32[8,128], index: 7, kind: output, shape index: {}]  }
   0x1   :  { %13 = vsyncpa [#allocation6], 0 }
   0x2   :  { %14 = vsyncpa [#allocation9], 0 }
   0x3   :  { %15 = vsyncpa [#allocation4], 0  ;;  %s720_s24 = smov [#allocation5]   ;;  %s602_s28 = scalar_lea.hbm %s878_s1, 1024 }
   0x4   :  { %s31_s25 = sshll.u32 %s720_s24, 4  ;;  %p603_p0 = scmp.ne.s32.totalorder %s878_s1, %s602_s28  ;;  %s32_s25 = int_to_ptr.vmem [resolvable:$true] %s31_s25 }
   0x5   :  { %p606_p1 = scmp.lt.u32.totalorder %s602_s28, %s878_s1 }
   0x7   :  { %p608_p2 = pnand %p606_p1, %p603_p0 }
   0x9   :  { %611 = shalt.err (!%p608_p2)
}
   0xa   :  { %s612_s10 = scalar_lea.vmem %s32_s25, 1024  ;;  %p617_p4 = scmp.lt.s32.totalorder %s32_s25, %s32_s25 }
   0xb   :  { %p613_p3 = scmp.ne.s32.totalorder %s32_s25, %s612_s10  ;;  %p618_p5 = scmp.lt.s32.totalorder %s612_s10, %s612_s10 }
   0xd   :  { %p619_p6 = por %p618_p5, %p617_p4 }
   0xf   :  { %p620_p7 = pnand %p619_p6, %p613_p3 }
  0x11   :  { %623 = shalt.err (!%p620_p7)
}
  0x12   :  { %s721_s11 = smov 64   ;;  %s722_s12 = smov 4  }
  0x13   :  { %37 = dma.hbm_to_vmem [thread:$0]  %s878_s1, 1024, %s32_s25, [#allocation6], %s721_s11, %s721_s11, %s722_s12  }
  0x14   :  { %s723_s15 = smov [#allocation2]   ;;  %s724_s17 = smov [#allocation7]  }
  0x15   :  { %s22_s16 = sshll.u32 %s723_s15, 4  ;;  %s45_s18 = sshll.u32 %s724_s17, 4  ;;  %s23_s16 = int_to_ptr.vmem [resolvable:$true] %s22_s16  ;;  %s46_s18 = int_to_ptr.vmem [resolvable:$true] %s45_s18 }
  0x16   :  { %s624_s21 = scalar_lea.hbm %s877_s0, 64 }
  0x17   :  { %p625_p8 = scmp.ne.s32.totalorder %s877_s0, %s624_s21  ;;  %p628_p9 = scmp.lt.u32.totalorder %s624_s21, %s877_s0 }
  0x19   :  { %p630_p10 = pnand %p628_p9, %p625_p8 }
  0x1b   :  { %633 = shalt.err (!%p630_p10)
}
  0x1c   :  { %s634_s1 = scalar_lea.vmem %s23_s16, 64  ;;  %p639_p12 = scmp.lt.s32.totalorder %s23_s16, %s23_s16 }
  0x1d   :  { %p635_p11 = scmp.ne.s32.totalorder %s23_s16, %s634_s1  ;;  %p640_p13 = scmp.lt.s32.totalorder %s634_s1, %s634_s1 }
  0x1f   :  { %p641_p0 = por %p640_p13, %p639_p12 }
  0x21   :  { %p642_p1 = pnand %p641_p0, %p635_p11 }
  0x23   :  { %645 = shalt.err (!%p642_p1)
}
  0x24   :  { %25 = dma.hbm_to_vmem [thread:$0]  %s877_s0, 64, %s23_s16, [#allocation3]  }
  0x25   :  { %s646_s30 = scalar_lea.hbm %s880_s3, 1024 }
  0x26   :  { %p647_p2 = scmp.ne.s32.totalorder %s880_s3, %s646_s30  ;;  %p650_p3 = scmp.lt.u32.totalorder %s646_s30, %s880_s3 }
  0x28   :  { %p652_p4 = pnand %p650_p3, %p647_p2 }
  0x2a   :  { %655 = shalt.err (!%p652_p4)
}
  0x2b   :  { %s656_s14 = scalar_lea.vmem %s46_s18, 1024  ;;  %p661_p6 = scmp.lt.s32.totalorder %s46_s18, %s46_s18 }
  0x2c   :  { %p657_p5 = scmp.ne.s32.totalorder %s46_s18, %s656_s14  ;;  %p662_p7 = scmp.lt.s32.totalorder %s656_s14, %s656_s14 }
  0x2e   :  { %p663_p8 = por %p662_p7, %p661_p6 }
  0x30   :  { %p664_p9 = pnand %p663_p8, %p657_p5 }
  0x32   :  { %667 = shalt.err (!%p664_p9)
}
  0x33   :  { %51 = dma.hbm_to_vmem [thread:$0]  %s880_s3, 1024, %s46_s18, [#allocation6], %s721_s11, %s721_s11, %s722_s12  }
  0x34   :  { %s725_s16 = smov [#allocation8]   ;;  %s668_s21 = scalar_lea.hbm %s882_s5, 1024 }
  0x35   :  { %s59_s17 = sshll.u32 %s725_s16, 4  ;;  %p669_p10 = scmp.ne.s32.totalorder %s882_s5, %s668_s21  ;;  %s60_s17 = int_to_ptr.vmem [resolvable:$true] %s59_s17 }
  0x36   :  { %p672_p11 = scmp.lt.u32.totalorder %s668_s21, %s882_s5 }
  0x38   :  { %p674_p12 = pnand %p672_p11, %p669_p10 }
  0x3a   :  { %677 = shalt.err (!%p674_p12)
}
  0x3b   :  { %s678_s1 = scalar_lea.vmem %s60_s17, 1024  ;;  %p683_p0 = scmp.lt.s32.totalorder %s60_s17, %s60_s17 }
  0x3c   :  { %p679_p13 = scmp.ne.s32.totalorder %s60_s17, %s678_s1  ;;  %p684_p1 = scmp.lt.s32.totalorder %s678_s1, %s678_s1 }
  0x3e   :  { %p685_p2 = por %p684_p1, %p683_p0 }
  0x40   :  { %p686_p3 = pnand %p685_p2, %p679_p13 }
  0x42   :  { %689 = shalt.err (!%p686_p3)
}
  0x43   :  { %65 = dma.hbm_to_vmem [thread:$0]  %s882_s5, 1024, %s60_s17, [#allocation9], %s721_s11, %s721_s11, %s722_s12  }
  0x44   :  { %712 = dma.done.wait [#allocation3], 64  }
  0x45   :  { %713 = vsyncadd [#allocation3], 4294967232 }
  0x46   :  { %714 = dma.done.wait [#allocation6], 2048  }
  0x47   :  { %715 = vsyncadd [#allocation6], 4294965248 }
  0x48   :  { %716 = dma.done.wait [#allocation9], 1024  }
  0x49   :  { %717 = vsyncadd [#allocation9], 4294966272  ;;  %v726_v0 = vmov 0.0   ;;  %vm727_vm0 = vmmov 0   ;;  %v574_v1 = vld [vmem:[#allocation5] sm:$0xff]   ;;  %v575_v2 = vld [vmem:[#allocation5 + $0x8] sm:$0xff]   ;;  %v419_v42 = vlaneseq }
  0x4a   :  { %505 = vmatprep.subr.bf16.mxu0 %v726_v0  ;;  %521 = vmatprep.mubr.msk.bf16.mxu0 %vm727_vm0, %v726_v0  ;;  %v576_v3 = vld [vmem:[#allocation5 + $0x10] sm:$0xff]   ;;  %v582_v4 = vld [vmem:[#allocation7] sm:$0xff]   ;;  %v577_v5 = vld [vmem:[#allocation5 + $0x18] sm:$0xff]  }
  0x4b   :  { %525 = vmatprep.subr.bf16.mxu1 %v726_v0  ;;  %541 = vmatprep.mubr.msk.bf16.mxu1 %vm727_vm0, %v726_v0  ;;  %v583_v6 = vld [vmem:[#allocation7 + $0x8] sm:$0xff]   ;;  %v578_v7 = vld [vmem:[#allocation5 + $0x20] sm:$0xff]   ;;  %v584_v8 = vld [vmem:[#allocation7 + $0x10] sm:$0xff]   ;;  %v420_v43 = vand.u32 127, %v419_v42 }
  0x4c   :  { %506 = vmatpush3.bf16.msra.mxu0 %v574_v1  ;;  %526 = vmatpush3.bf16.msra.mxu1 %v582_v4  ;;  %v579_v9 = vld [vmem:[#allocation5 + $0x28] sm:$0xff]   ;;  %v585_v10 = vld [vmem:[#allocation7 + $0x18] sm:$0xff]   ;;  %v580_v11 = vld [vmem:[#allocation5 + $0x30] sm:$0xff]  }
  0x4d   :  { %507 = vmatprep.subr.bf16.mxu0 %v726_v0  ;;  %527 = vmatprep.subr.bf16.mxu1 %v726_v0  ;;  %v586_v12 = vld [vmem:[#allocation7 + $0x20] sm:$0xff]   ;;  %v581_v13 = vld [vmem:[#allocation5 + $0x38] sm:$0xff]   ;;  %v587_v14 = vld [vmem:[#allocation7 + $0x28] sm:$0xff]   ;;  %vm421_vm1 = vcmp.lt.s32.totalorder %v420_v43, 16 }
  0x4e   :  { %v81_v15 = vld [vmem:[#allocation2] sm:$0xf]  ;;  %v588_v16 = vld [vmem:[#allocation7 + $0x30] sm:$0xff]   ;;  %v590_v18 = vld [vmem:[#allocation8] sm:$0xff]  }
  0x4f   :  { %v589_v17 = vld [vmem:[#allocation7 + $0x38] sm:$0xff]   ;;  %v591_v19 = vld [vmem:[#allocation8 + $0x8] sm:$0xff]   ;;  %v592_v20 = vld [vmem:[#allocation8 + $0x10] sm:$0xff]  }
  0x50   :  { %508 = vmatpush3.bf16.msra.mxu0 %v575_v2  ;;  %528 = vmatpush3.bf16.msra.mxu1 %v583_v6  ;;  %v593_v21 = vld [vmem:[#allocation8 + $0x18] sm:$0xff]   ;;  %v594_v22 = vld [vmem:[#allocation8 + $0x20] sm:$0xff]   ;;  %v595_v23 = vld [vmem:[#allocation8 + $0x28] sm:$0xff]  }
  0x51   :  { %509 = vmatprep.subr.bf16.mxu0 %v726_v0  ;;  %529 = vmatprep.subr.bf16.mxu1 %v726_v0  ;;  %v451_v24 = vld [vmem:[%s879_s2] ss:$0 sm:$0xff]  ;;  %v596_v32 = vld [vmem:[#allocation8 + $0x30] sm:$0xff]  }
  0x52   :  { %v597_v33 = vld [vmem:[#allocation8 + $0x38] sm:$0xff]  }
  0x53   :  { %v460_v34 = vld [vmem:[%s881_s4] ss:$0 sm:$0xff]  ;;  %s728_s4 = smov [#allocation10]  }
  0x54   :  { %510 = vmatpush3.bf16.msra.mxu0 %v576_v3  ;;  %530 = vmatpush3.bf16.msra.mxu1 %v584_v8  ;;  %v469_v44 = vld [vmem:[%s883_s6] ss:$0 sm:$0xff]  ;;  %s440_s28 = sshll.u32 %s728_s4, 4  ;;  %s441_s28 = int_to_ptr.vmem [resolvable:$true] %s440_s28 }
  0x55   :  { %511 = vmatprep.subr.bf16.mxu0 %v726_v0  ;;  %531 = vmatprep.subr.bf16.mxu1 %v726_v0  ;;  %s690_s6 = scalar_lea.vmem %s441_s28, 128  ;;  %p695_p5 = scmp.lt.s32.totalorder %s441_s28, %s441_s28 }
  0x56   :  { %p691_p4 = scmp.ne.s32.totalorder %s441_s28, %s690_s6  ;;  %p696_p6 = scmp.lt.s32.totalorder %s690_s6, %s690_s6 }
  0x58   :  { %512 = vmatpush3.bf16.msra.mxu0 %v577_v5  ;;  %532 = vmatpush3.bf16.msra.mxu1 %v585_v10  ;;  %p697_p7 = por %p696_p6, %p695_p5 }
  0x59   :  { %513 = vmatprep.subr.bf16.mxu0 %v726_v0  ;;  %533 = vmatprep.subr.bf16.mxu1 %v726_v0 }
  0x5a   :  { %p698_p8 = pnand %p697_p7, %p691_p4 }
  0x5c   :  { %514 = vmatpush3.bf16.msra.mxu0 %v578_v7  ;;  %534 = vmatpush3.bf16.msra.mxu1 %v586_v12 }
  0x5d   :  { %515 = vmatprep.subr.bf16.mxu0 %v726_v0  ;;  %535 = vmatprep.subr.bf16.mxu1 %v726_v0 }
  0x60   :  { %516 = vmatpush3.bf16.msra.mxu0 %v579_v9  ;;  %536 = vmatpush3.bf16.msra.mxu1 %v587_v14 }
  0x61   :  { %517 = vmatprep.subr.bf16.mxu0 %v726_v0  ;;  %537 = vmatprep.subr.bf16.mxu1 %v726_v0 }
  0x64   :  { %518 = vmatpush3.bf16.msra.mxu0 %v580_v11  ;;  %538 = vmatpush3.bf16.msra.mxu1 %v588_v16 }
  0x65   :  { %519 = vmatprep.subr.bf16.mxu0 %v726_v0  ;;  %539 = vmatprep.subr.bf16.mxu1 %v726_v0 }
  0x68   :  { %520 = vmatpush3.bf16.msra.mxu0 %v581_v13  ;;  %540 = vmatpush3.bf16.msra.mxu1 %v589_v17 }
  0x69   :  { %545 = vmatprep.subr.bf16.mxu0 %v726_v0 }
  0x6b   :  { %522 = vmatmul.mubr.bf16.vlgmr.msra.gmra.mrb[0].mxu0 %v81_v15 }
  0x6c   :  { %561 = vmatprep.mubr.msk.bf16.mxu0 %vm727_vm0, %v726_v0  ;;  %546 = vmatpush3.bf16.msra.mxu0 %v590_v18 }
  0x6d   :  { %547 = vmatprep.subr.bf16.mxu0 %v726_v0 }
  0x70   :  { %548 = vmatpush3.bf16.msra.mxu0 %v591_v19 }
  0x71   :  { %549 = vmatprep.subr.bf16.mxu0 %v726_v0 }
  0x74   :  { %550 = vmatpush3.bf16.msra.mxu0 %v592_v20 }
  0x75   :  { %551 = vmatprep.subr.bf16.mxu0 %v726_v0 }
  0x78   :  { %552 = vmatpush3.bf16.msra.mxu0 %v593_v21 }
  0x79   :  { %553 = vmatprep.subr.bf16.mxu0 %v726_v0 }
  0x7c   :  { %554 = vmatpush3.bf16.msra.mxu0 %v594_v22 }
  0x7d   :  { %555 = vmatprep.subr.bf16.mxu0 %v726_v0 }
  0x80   :  { %556 = vmatpush3.bf16.msra.mxu0 %v595_v23 }
  0x81   :  { %557 = vmatprep.subr.bf16.mxu0 %v726_v0 }
  0x84   :  { %558 = vmatpush3.bf16.msra.mxu0 %v596_v32 }
  0x85   :  { %559 = vmatprep.subr.bf16.mxu0 %v726_v0 }
  0x88   :  { %560 = vmatpush3.bf16.msra.mxu0 %v597_v33 }
 0x13e   :  { %v187_v25 = vpop.f32.mrb[0].mxu0 }
 0x13f   :  { %v188_v26 = vadd.f32 %v451_v24, %v187_v25  ;;  %v523_v27 = vpop.f32.mrb[1].mxu0 }
 0x140   :  { %v190_v28 = vpop.f32.mrb[2].mxu0 }
 0x141   :  { %v193_v29 = vmax.f32 %v188_v26, 0.0  ;;  %v524_v30 = vpop.f32.mrb[3].mxu0 }
 0x143   :  { %v194_v31 = vpack.c.bf16 %v193_v29, %v193_v29 }
 0x145   :  { %542 = vmatmul.mubr.bf16.vlgmr.msra.gmra.mrb[0].mxu1 %v194_v31 }
 0x218   :  { %v300_v35 = vpop.f32.mrb[0].mxu1 }
 0x219   :  { %v301_v36 = vadd.f32 %v460_v34, %v300_v35  ;;  %v543_v37 = vpop.f32.mrb[1].mxu1 }
 0x21a   :  { %v303_v38 = vpop.f32.mrb[2].mxu1 }
 0x21b   :  { %v306_v39 = vmax.f32 %v301_v36, 0.0  ;;  %v544_v40 = vpop.f32.mrb[3].mxu1 }
 0x21d   :  { %v307_v41 = vpack.c.bf16 %v306_v39, %v306_v39 }
 0x21f   :  { %562 = vmatmul.mubr.bf16.vlgmr.msra.gmra.mrb[4].mxu0 %v307_v41 }
 0x2f2   :  { %v413_v45 = vpop.f32.mrb[4].mxu0 }
 0x2f3   :  { %v414_v46 = vadd.f32 %v469_v44, %v413_v45  ;;  %v563_v47 = vpop.f32.mrb[5].mxu0 }
 0x2f4   :  { %v416_v48 = vpop.f32.mrb[6].mxu0 }
 0x2f5   :  { %v564_v49 = vpop.f32.mrb[7].mxu0  ;;  %v422_v50 = vsel %vm421_vm1, %v414_v46, -1e+30 }
 0x2f6   :  { %423 = vmax.xlane.f32.xlu0 %v422_v50 }
 0x383   :  { %v424_v51 = vpop.xlane.xlu0 %423 }
 0x384   :  { %v425_v52 = vsub.f32 %v422_v50, %v424_v51 }
 0x386   :  { %v426_v53 = vmul.f32 1.442695, %v425_v52 }
 0x388   :  { %598 = vpow2.f32 %v426_v53 }
 0x392   :  { %v599_v54 = vpop.eup %598 }
 0x393   :  { %428 = vadd.xlane.f32.xlu0 %v599_v54 }
 0x420   :  { %v429_v55 = vpop.xlane.xlu0 %428 }
 0x421   :  { %600 = vlog2.f32 %v429_v55 }
 0x42b   :  { %v601_v56 = vpop.eup %600 }
 0x42c   :  { %v431_v57 = vmul.f32 0.6931472, %v601_v56 }
 0x42e   :  { %v432_v58 = vsub.f32 %v425_v52, %v431_v57 }
 0x430   :  { %433 = vst [vmem:[#allocation10] sm:$0xff] %v432_v58 }
 0x431   :  { %701 = shalt.err (!%p698_p8)
}
 0x432   :  { %s702_s8 = scalar_lea.hbm %s884_s7, 128 }
 0x433   :  { %p703_p9 = scmp.ne.s32.totalorder %s884_s7, %s702_s8  ;;  %p706_p10 = scmp.lt.u32.totalorder %s702_s8, %s884_s7 }
 0x435   :  { %p708_p11 = pnand %p706_p10, %p703_p9 }
 0x437   :  { %711 = shalt.err (!%p708_p11)
}
 0x438   :  { %443 = dma.vmem_to_hbm [thread:$0]  %s441_s28, 128, %s884_s7, [#allocation4]  }
 0x439   :  { %718 = dma.done.wait [#allocation4], 128  }
 0x43a   :  { %719 = vsyncadd [#allocation4], 4294967168 }
 0x43b   :  { %447 = vsyncpa [#allocation3], 1 }
 0x43c   :  { %448 = vsyncpa [#allocation6], 1 }
 0x43d   :  { %449 = vsyncpa [#allocation9], 1 }
 0x43e   :  { %450 = vsyncpa [#allocation4], 1 }

</bundles_post_ra>
